<compile_context>
chip_gen: v6e
topology: v6e:2x2x1
jax: 0.10.0
libtpu: 0.0.40
codegen_flags: <defaults>
</compile_context>

<pallas_src>
import math
import functools

import jax
import jax.numpy as jnp
from jax.experimental import pallas as pl
from jax.experimental.pallas import tpu as pltpu


def _round_up(x, m):
    return ((x + m - 1) // m) * m


def _enc_coor_kernel(x_ref, w1_ref, b1_ref, w2_ref, b2_ref, w3_ref, b3_ref,
                     eps_t_ref, out_t_ref, *, z_dim):
    x = x_ref[...]

    # Layer 1: Linear(num_pixels, num_hidden) + ReLU   (bf16 MXU, f32 accum)
    h = jnp.dot(x, w1_ref[...], preferred_element_type=jnp.float32) + b1_ref[...]
    h = jnp.maximum(h, 0.0)

    # Fused layer 2: [where_mean.lin1 | where_log_std.lin1] + ReLU
    h2 = jnp.dot(h.astype(w2_ref.dtype), w2_ref[...],
                 preferred_element_type=jnp.float32) + b2_ref[...]
    h2 = jnp.maximum(h2, 0.0)

    # Fused layer 3: block-diagonal [W3m 0; 0 W3s] -> both heads in one matmul
    o = jnp.dot(h2.astype(w3_ref.dtype), w3_ref[...],
                preferred_element_type=jnp.float32) + b3_ref[...]   # (TB, 2*D)

    # One small XLU transpose; the elementwise epilogue then runs on
    # lane-dense (D, TB) tiles instead of 4-of-128-lane (TB, 2*D) tiles.
    o_t = o.T                                                       # (2*D, TB)
    q_mean_t = jnp.tanh(o_t[:z_dim, :])                             # (D, TB)
    q_std_t = jnp.exp(o_t[z_dim:, :])                               # same (unclamped) exp as reference
    z_t = q_mean_t + q_std_t * eps_t_ref[...]                       # reparameterized sample

    # Lane-dense output slab [q_mean; q_std; z] (3*D, TB): sublane-axis concat,
    # single full-lane store (no masked vst.msk on a 6-lane block).
    out_t_ref[...] = jnp.concatenate([q_mean_t, q_std_t, z_t], axis=0)


def enc_coor_forward(conved, params, eps, *, batch_tile=None, use_bf16=True):
    """conved: (B, num_pixels) f32; eps: (B, z_where_dim) f32 std-normal noise.

    Returns (q_mean, q_std, z_where), each (B, z_where_dim) f32.
    """
    B, P = conved.shape
    H = params["w1"].shape[1]
    H2 = params["w2m"].shape[1]
    D = params["w3m"].shape[1]

    # --- fuse branch weights (f32), then cast MXU operands -----------------
    w2 = jnp.concatenate([params["w2m"], params["w2s"]], axis=1)   # (H, 2*H2)
    b2 = jnp.concatenate([params["b2m"], params["b2s"]], axis=1)   # (1, 2*H2)
    w3 = jnp.zeros((2 * H2, 2 * D), jnp.float32)
    w3 = w3.at[:H2, :D].set(params["w3m"]).at[H2:, D:].set(params["w3s"])
    b3 = jnp.concatenate([params["b3m"], params["b3s"]], axis=1)   # (1, 2*D)

    mxu_dtype = jnp.bfloat16 if use_bf16 else jnp.float32
    x = conved.astype(mxu_dtype)
    w1 = params["w1"].astype(mxu_dtype)
    w2 = w2.astype(mxu_dtype)
    w3 = w3.astype(mxu_dtype)
    b1 = params["b1"].astype(jnp.float32)
    b2 = b2.astype(jnp.float32)
    b3 = b3.astype(jnp.float32)
    eps_t = eps.astype(jnp.float32).T                              # (D, B) lane-dense

    # --- batch tiling -------------------------------------------------------
    if batch_tile is None:
        batch_tile = 2048          # HBM-roofline-efficient tile (multiple of 256)
    if B <= 512:
        # Small batch: one tile == full array -> grid=1, no divisibility
        # constraints, no per-step overhead.
        TB = B
    else:
        # Large batch: lane/sublane-aligned tile (multiple of 256); prefer at
        # least 2 grid steps so "parallel" shards across v7x's two TCs.
        TB = _round_up(min(batch_tile, -(-B // 2)), 256)
    grid = (pl.cdiv(B, TB),)

    const = lambda i: (0, 0)          # weights: resident, fetched once
    row_tiled = lambda i: (i, 0)      # batch-major arrays (x)
    col_tiled = lambda i: (0, i)      # batch-minor (transposed) arrays (eps, out)

    in_specs = [
        pl.BlockSpec((TB, P), row_tiled),      # x
        pl.BlockSpec((P, H), const),           # w1
        pl.BlockSpec((1, H), const),           # b1
        pl.BlockSpec((H, 2 * H2), const),      # w2 (fused)
        pl.BlockSpec((1, 2 * H2), const),      # b2 (fused)
        pl.BlockSpec((2 * H2, 2 * D), const),  # w3 (block-diagonal)
        pl.BlockSpec((1, 2 * D), const),       # b3 (fused)
        pl.BlockSpec((D, TB), col_tiled),      # eps (transposed, lane-dense)
    ]
    out_specs = pl.BlockSpec((3 * D, TB), col_tiled)

    bpe = 2 if use_bf16 else 4
    cost = pl.CostEstimate(
        flops=2 * B * (P * H + H * (2 * H2) + (2 * H2) * (2 * D)),
        transcendentals=2 * B * D,
        bytes_accessed=(B * P * bpe + (P * H + H * 2 * H2 + 4 * H2 * D) * bpe
                        + B * D * 4 + B * 3 * D * 4),
    )

    out_t = pl.pallas_call(
        functools.partial(_enc_coor_kernel, z_dim=D),
        out_shape=jax.ShapeDtypeStruct((3 * D, B), jnp.float32),
        grid=grid,
        in_specs=in_specs,
        out_specs=out_specs,
        compiler_params=pltpu.CompilerParams(
            dimension_semantics=("parallel",),
            vmem_limit_bytes=32 * 1024 * 1024),
        cost_estimate=cost,
    )(x, w1, b1, w2, b2, w3, b3, eps_t)

    q_mean = out_t[:D, :].T
    q_std = out_t[D:2 * D, :].T
    z_where = out_t[2 * D:, :].T
    return q_mean, q_std, z_where


def init_params(key, num_pixels, num_hidden, z_where_dim):
    """Deterministic synthetic init matching the PyTorch layer shapes."""
    H2 = int(0.5 * num_hidden)
    shapes = {
        "w1": (num_pixels, num_hidden), "b1": (1, num_hidden),
        "w2m": (num_hidden, H2), "b2m": (1, H2),
        "w3m": (H2, z_where_dim), "b3m": (1, z_where_dim),
        "w2s": (num_hidden, H2), "b2s": (1, H2),
        "w3s": (H2, z_where_dim), "b3s": (1, z_where_dim),
    }
    params = {}
    keys = jax.random.split(key, len(shapes))
    for (name, shape), k in zip(sorted(shapes.items()), keys):
        fan_in = shape[0] if name.startswith("w") else shape[1]
        bound = 1.0 / math.sqrt(max(fan_in, 1))
        params[name] = jax.random.uniform(
            k, shape, jnp.float32, minval=-bound, maxval=bound)
    return params


def reference_forward(conved, params, eps, *, use_bf16=True):
    """Pure-JAX reference with the same bf16 matmul inputs / f32 accumulation."""
    mxu = jnp.bfloat16 if use_bf16 else jnp.float32
    relu = lambda v: jnp.maximum(v, 0.0)
    dot = lambda a, b: jnp.dot(a.astype(mxu), b.astype(mxu),
                               preferred_element_type=jnp.float32)
    h = relu(dot(conved, params["w1"]) + params["b1"])
    hm = relu(dot(h, params["w2m"]) + params["b2m"])
    hs = relu(dot(h, params["w2s"]) + params["b2s"])
    q_mean = jnp.tanh(dot(hm, params["w3m"]) + params["b3m"])
    q_std = jnp.exp(dot(hs, params["w3s"]) + params["b3s"])
    return q_mean, q_std, q_mean + q_std * eps


if __name__ == "__main__":
    # small shapes consistent with the module's MLP structure
    NUM_PIXELS, NUM_HIDDEN, Z_WHERE_DIM = 256, 128, 2

    key = jax.random.PRNGKey(0)
    k_param, k_x, k_eps, k_x2, k_eps2 = jax.random.split(key, 5)
    params = init_params(k_param, NUM_PIXELS, NUM_HIDDEN, Z_WHERE_DIM)

    # ---- small-B path: single full tile, grid=(1,) -------------------------
    B = 24
    conved = jax.random.normal(k_x, (B, NUM_PIXELS), jnp.float32)
    eps = jax.random.normal(k_eps, (B, Z_WHERE_DIM), jnp.float32)

    q_mean, q_std, z_where = enc_coor_forward(conved, params, eps)
    jax.block_until_ready((q_mean, q_std, z_where))

    # glue (plain JAX): Normal(q_mean, q_std).log_prob(z_where), as in q.normal(...)
    log_prob = (-0.5 * ((z_where - q_mean) / q_std) ** 2
                - jnp.log(q_std) - 0.5 * math.log(2.0 * math.pi))
    jax.block_until_ready(log_prob)

    r_mean, r_std, r_z = reference_forward(conved, params, eps)
    assert jnp.allclose(q_mean, r_mean, atol=2e-2, rtol=2e-2)
    assert jnp.allclose(q_std, r_std, atol=2e-2, rtol=2e-2)
    assert jnp.allclose(z_where, r_z, atol=2e-2, rtol=2e-2)

    # ---- tiled path: TB=256 (lane-dense blocks), partial final tile ---------
    B2 = 600
    conved2 = jax.random.normal(k_x2, (B2, NUM_PIXELS), jnp.float32)
    eps2 = jax.random.normal(k_eps2, (B2, Z_WHERE_DIM), jnp.float32)

    q_mean2, q_std2, z_where2 = enc_coor_forward(
        conved2, params, eps2, batch_tile=256)
    jax.block_until_ready((q_mean2, q_std2, z_where2))

    r_mean2, r_std2, r_z2 = reference_forward(conved2, params, eps2)
    assert jnp.allclose(q_mean2, r_mean2, atol=2e-2, rtol=2e-2)
    assert jnp.allclose(q_std2, r_std2, atol=2e-2, rtol=2e-2)
    assert jnp.allclose(z_where2, r_z2, atol=2e-2, rtol=2e-2)

    print("KERNEL_OK")
</pallas_src>

<mosaic_0001>
module attributes {stable_mosaic.version = 11 : i64} {
  func.func @_enc_coor_kernel(%arg0: i32, %arg1: memref<24x256xbf16, #tpu.memory_space<vmem>>, %arg2: memref<256x128xbf16, #tpu.memory_space<vmem>>, %arg3: memref<1x128xf32, #tpu.memory_space<vmem>>, %arg4: memref<128x128xbf16, #tpu.memory_space<vmem>>, %arg5: memref<1x128xf32, #tpu.memory_space<vmem>>, %arg6: memref<128x4xbf16, #tpu.memory_space<vmem>>, %arg7: memref<1x4xf32, #tpu.memory_space<vmem>>, %arg8: memref<2x24xf32, #tpu.memory_space<vmem>>, %arg9: memref<6x24xf32, #tpu.memory_space<vmem>>) attributes {dimension_semantics = [#tpu.dimension_semantics<parallel>], iteration_bounds = array<i64: 1>, scalar_prefetch = 0 : i64, scratch_operands = 0 : i64, tpu.core_type = #tpu.core_type<tc>, window_params = [{transform_indices = @transform_0, window_bounds = array<i64: 24, 256>}, {pipeline_mode = #tpu.pipeline_mode<synchronous>, transform_indices = @transform_1, window_bounds = array<i64: 256, 128>}, {pipeline_mode = #tpu.pipeline_mode<synchronous>, transform_indices = @transform_2, window_bounds = array<i64: 1, 128>}, {pipeline_mode = #tpu.pipeline_mode<synchronous>, transform_indices = @transform_3, window_bounds = array<i64: 128, 128>}, {pipeline_mode = #tpu.pipeline_mode<synchronous>, transform_indices = @transform_4, window_bounds = array<i64: 1, 128>}, {pipeline_mode = #tpu.pipeline_mode<synchronous>, transform_indices = @transform_5, window_bounds = array<i64: 128, 4>}, {pipeline_mode = #tpu.pipeline_mode<synchronous>, transform_indices = @transform_6, window_bounds = array<i64: 1, 4>}, {transform_indices = @transform_7, window_bounds = array<i64: 2, 24>}, {transform_indices = @transform_8, window_bounds = array<i64: 6, 24>}]} {
    %c0 = arith.constant 0 : index
    %c0_0 = arith.constant 0 : index
    %0 = vector.load %arg1[%c0, %c0_0] : memref<24x256xbf16, #tpu.memory_space<vmem>>, vector<24x256xbf16>
    %c0_1 = arith.constant 0 : index
    %c0_2 = arith.constant 0 : index
    %1 = vector.load %arg2[%c0_1, %c0_2] : memref<256x128xbf16, #tpu.memory_space<vmem>>, vector<256x128xbf16>
    %cst = arith.constant dense<0.000000e+00> : vector<24x128xf32>
    %2 = tpu.matmul %0, %1, %cst {dimension_numbers = #tpu.dot_dimension_numbers<[1], [0], [0], [1], [0, 0, 1, 1], [], []>} : vector<24x256xbf16>, vector<256x128xbf16>, vector<24x128xf32> -> vector<24x128xf32>
    %c0_3 = arith.constant 0 : index
    %c0_4 = arith.constant 0 : index
    %3 = vector.load %arg3[%c0_3, %c0_4] : memref<1x128xf32, #tpu.memory_space<vmem>>, vector<1x128xf32>
    %4 = vector.broadcast %3 : vector<1x128xf32> to vector<24x128xf32>
    %5 = arith.addf %2, %4 : vector<24x128xf32>
    %cst_5 = arith.constant 0.000000e+00 : f32
    %6 = vector.broadcast %cst_5 : f32 to vector<24x128xf32>
    %7 = arith.maximumf %5, %6 : vector<24x128xf32>
    %8 = arith.truncf %7 : vector<24x128xf32> to vector<24x128xbf16>
    %c0_6 = arith.constant 0 : index
    %c0_7 = arith.constant 0 : index
    %9 = vector.load %arg4[%c0_6, %c0_7] : memref<128x128xbf16, #tpu.memory_space<vmem>>, vector<128x128xbf16>
    %cst_8 = arith.constant dense<0.000000e+00> : vector<24x128xf32>
    %10 = tpu.matmul %8, %9, %cst_8 {dimension_numbers = #tpu.dot_dimension_numbers<[1], [0], [0], [1], [0, 0, 1, 1], [], []>} : vector<24x128xbf16>, vector<128x128xbf16>, vector<24x128xf32> -> vector<24x128xf32>
    %c0_9 = arith.constant 0 : index
    %c0_10 = arith.constant 0 : index
    %11 = vector.load %arg5[%c0_9, %c0_10] : memref<1x128xf32, #tpu.memory_space<vmem>>, vector<1x128xf32>
    %12 = vector.broadcast %11 : vector<1x128xf32> to vector<24x128xf32>
    %13 = arith.addf %10, %12 : vector<24x128xf32>
    %cst_11 = arith.constant 0.000000e+00 : f32
    %14 = vector.broadcast %cst_11 : f32 to vector<24x128xf32>
    %15 = arith.maximumf %13, %14 : vector<24x128xf32>
    %16 = arith.truncf %15 : vector<24x128xf32> to vector<24x128xbf16>
    %c0_12 = arith.constant 0 : index
    %c0_13 = arith.constant 0 : index
    %17 = vector.load %arg6[%c0_12, %c0_13] : memref<128x4xbf16, #tpu.memory_space<vmem>>, vector<128x4xbf16>
    %cst_14 = arith.constant dense<0.000000e+00> : vector<24x4xf32>
    %18 = tpu.matmul %16, %17, %cst_14 {dimension_numbers = #tpu.dot_dimension_numbers<[1], [0], [0], [1], [0, 0, 1, 1], [], []>} : vector<24x128xbf16>, vector<128x4xbf16>, vector<24x4xf32> -> vector<24x4xf32>
    %c0_15 = arith.constant 0 : index
    %c0_16 = arith.constant 0 : index
    %19 = vector.load %arg7[%c0_15, %c0_16] : memref<1x4xf32, #tpu.memory_space<vmem>>, vector<1x4xf32>
    %20 = vector.broadcast %19 : vector<1x4xf32> to vector<24x4xf32>
    %21 = arith.addf %18, %20 : vector<24x4xf32>
    %22 = tpu.transpose %21, [1, 0] : vector<24x4xf32> -> vector<4x24xf32>
    %23 = vector.extract_strided_slice %22 {offsets = [0, 0], sizes = [2, 24], strides = [1, 1]} : vector<4x24xf32> to vector<2x24xf32>
    %24 = math.tanh %23 : vector<2x24xf32>
    %25 = vector.extract_strided_slice %22 {offsets = [2, 0], sizes = [2, 24], strides = [1, 1]} : vector<4x24xf32> to vector<2x24xf32>
    %26 = math.exp %25 : vector<2x24xf32>
    %c0_17 = arith.constant 0 : index
    %c0_18 = arith.constant 0 : index
    %27 = vector.load %arg8[%c0_17, %c0_18] : memref<2x24xf32, #tpu.memory_space<vmem>>, vector<2x24xf32>
    %28 = arith.mulf %26, %27 : vector<2x24xf32>
    %29 = arith.addf %24, %28 : vector<2x24xf32>
    %30 = tpu.concatenate %24, %26, %29 in 0 : vector<2x24xf32>, vector<2x24xf32>, vector<2x24xf32> -> vector<6x24xf32>
    %c0_19 = arith.constant 0 : index
    %c0_20 = arith.constant 0 : index
    %31 = vector.load %arg9[%c0_19, %c0_20] : memref<6x24xf32, #tpu.memory_space<vmem>>, vector<6x24xf32>
    tpu.vector_store %arg9[%c0_19, %c0_20], %30 {strides = array<i32>} : memref<6x24xf32, #tpu.memory_space<vmem>>, vector<6x24xf32>,
    return
  }
  func.func @transform_0(%arg0: i32) -> (i32, i32) {
    %c0_i32 = arith.constant 0 : i32
    %c0_i32_0 = arith.constant 0 : i32
    return %arg0, %c0_i32 : i32, i32
  }
  func.func @transform_1(%arg0: i32) -> (i32, i32) {
    %c0_i32 = arith.constant 0 : i32
    %c0_i32_0 = arith.constant 0 : i32
    %c0_i32_1 = arith.constant 0 : i32
    return %c0_i32, %c0_i32_0 : i32, i32
  }
  func.func @transform_2(%arg0: i32) -> (i32, i32) {
    %c0_i32 = arith.constant 0 : i32
    %c0_i32_0 = arith.constant 0 : i32
    %c0_i32_1 = arith.constant 0 : i32
    return %c0_i32, %c0_i32_0 : i32, i32
  }
  func.func @transform_3(%arg0: i32) -> (i32, i32) {
    %c0_i32 = arith.constant 0 : i32
    %c0_i32_0 = arith.constant 0 : i32
    %c0_i32_1 = arith.constant 0 : i32
    return %c0_i32, %c0_i32_0 : i32, i32
  }
  func.func @transform_4(%arg0: i32) -> (i32, i32) {
    %c0_i32 = arith.constant 0 : i32
    %c0_i32_0 = arith.constant 0 : i32
    %c0_i32_1 = arith.constant 0 : i32
    return %c0_i32, %c0_i32_0 : i32, i32
  }
  func.func @transform_5(%arg0: i32) -> (i32, i32) {
    %c0_i32 = arith.constant 0 : i32
    %c0_i32_0 = arith.constant 0 : i32
    %c0_i32_1 = arith.constant 0 : i32
    return %c0_i32, %c0_i32_0 : i32, i32
  }
  func.func @transform_6(%arg0: i32) -> (i32, i32) {
    %c0_i32 = arith.constant 0 : i32
    %c0_i32_0 = arith.constant 0 : i32
    %c0_i32_1 = arith.constant 0 : i32
    return %c0_i32, %c0_i32_0 : i32, i32
  }
  func.func @transform_7(%arg0: i32) -> (i32, i32) {
    %c0_i32 = arith.constant 0 : i32
    %c0_i32_0 = arith.constant 0 : i32
    return %c0_i32, %arg0 : i32, i32
  }
  func.func @transform_8(%arg0: i32) -> (i32, i32) {
    %c0_i32 = arith.constant 0 : i32
    %c0_i32_0 = arith.constant 0 : i32
    return %c0_i32, %arg0 : i32, i32
  }
}

</mosaic_0001>

<bundles_post_ra>
// kernel: tpu_custom_call.1
= control target key start
LH: loop header
LB: loop body
LE: loop exit
PB: predicated region body
PF: predicated region fallthrough
CT: control target
= control target key end

     0   :  { %13 = vsyncpa [#allocation3], 0  ;;  %s942_s0 = inlined_call_operand.hbm [shape: bf16[24,256], index: 0, kind: input, shape index: {}]   ;;  %s943_s1 = inlined_call_operand.hbm [shape: bf16[256,128], index: 1, kind: input, shape index: {}]   ;;  %s944_s2 = inlined_call_operand.vmem [shape: f32[1,128], index: 2, kind: input, shape index: {}]   ;;  %s945_s3 = inlined_call_operand.vmem [shape: bf16[128,128], index: 3, kind: input, shape index: {}]   ;;  %s946_s4 = inlined_call_operand.vmem [shape: f32[1,128], index: 4, kind: input, shape index: {}]   ;;  %s947_s5 = inlined_call_operand.vmem [shape: bf16[128,4], index: 5, kind: input, shape index: {}]   ;;  %s948_s6 = inlined_call_operand.vmem [shape: f32[1,4], index: 6, kind: input, shape index: {}]   ;;  %s949_s7 = inlined_call_operand.vmem [shape: f32[2,24], index: 7, kind: input, shape index: {}]   ;;  %s950_s8 = inlined_call_operand.hbm [shape: f32[6,24], index: 8, kind: output, shape index: {}]  }
   0x1   :  { %14 = vsyncpa [#allocation6], 0 }
   0x2   :  { %15 = vsyncpa [#allocation4], 0  ;;  %s821_s27 = smov [#allocation2]  }
   0x3   :  { %s21_s28 = sshll.u32 %s821_s27, 4  ;;  %s22_s28 = int_to_ptr.vmem [resolvable:$true] %s21_s28 }
   0x4   :  { %s763_s29 = scalar_lea.vmem %s22_s28, 384  ;;  %p768_p1 = scmp.lt.s32.totalorder %s22_s28, %s22_s28 }
   0x5   :  { %p764_p0 = scmp.ne.s32.totalorder %s22_s28, %s763_s29  ;;  %p769_p2 = scmp.lt.s32.totalorder %s763_s29, %s763_s29 }
   0x7   :  { %p770_p3 = por %p769_p2, %p768_p1 }
   0x9   :  { %p771_p4 = pnand %p770_p3, %p764_p0 }
   0xb   :  { %774 = shalt.err (!%p771_p4)
}
   0xc   :  { %s822_s30 = smov 128   ;;  %s823_s9 = smov 8  }
   0xd   :  { %27 = dma.hbm_to_vmem [thread:$0]  %s942_s0, 384, %s22_s28, [#allocation3], %s822_s30, %s822_s30, %s823_s9  }
   0xe   :  { %s824_s12 = smov [#allocation5]  }
   0xf   :  { %s33_s13 = sshll.u32 %s824_s12, 4  ;;  %s34_s13 = int_to_ptr.vmem [resolvable:$true] %s33_s13 }
  0x10   :  { %s783_s14 = scalar_lea.vmem %s34_s13, 2048  ;;  %p788_p6 = scmp.lt.s32.totalorder %s34_s13, %s34_s13 }
  0x11   :  { %p784_p5 = scmp.ne.s32.totalorder %s34_s13, %s783_s14  ;;  %p789_p7 = scmp.lt.s32.totalorder %s783_s14, %s783_s14 }
  0x13   :  { %p790_p8 = por %p789_p7, %p788_p6 }
  0x15   :  { %p791_p9 = pnand %p790_p8, %p784_p5 }
  0x17   :  { %794 = shalt.err (!%p791_p9)
}
  0x18   :  { %s825_s15 = smov 64   ;;  %s826_s16 = smov 4  }
  0x19   :  { %39 = dma.hbm_to_vmem [thread:$0]  %s943_s1, 2048, %s34_s13, [#allocation6], %s825_s15, %s825_s15, %s826_s16  }
  0x1a   :  { %815 = dma.done.wait [#allocation3], 384  }
  0x1b   :  { %816 = vsyncadd [#allocation3], 4294966912 }
  0x1c   :  { %817 = dma.done.wait [#allocation6], 2048  }
  0x1d   :  { %818 = vsyncadd [#allocation6], 4294965248  ;;  %v714_v0 = vld [vmem:[#allocation5 + $0x78] sm:$0xff]   ;;  %v716_v2 = vld [vmem:[#allocation5 + $0x70] sm:$0xff]   ;;  %vm557_vm0 = vcmask 1041408   ;;  %vm559_vm1 = vcmask 1043456  }
  0x1e   :  { %v715_v1 = vld [vmem:[#allocation5 + $0x38] sm:$0xff]   ;;  %618 = vmatprep.subr.bf16.mxu0 %v714_v0  ;;  %v717_v3 = vld [vmem:[#allocation5 + $0x30] sm:$0xff]   ;;  %v718_v4 = vld [vmem:[#allocation5 + $0x68] sm:$0xff]   ;;  %vm561_vm2 = vcmask 193536  }
  0x1f   :  { %619 = vmatpush3.bf16.msra.mxu0 %v715_v1  ;;  %v719_v5 = vld [vmem:[#allocation5 + $0x28] sm:$0xff]   ;;  %v720_v6 = vld [vmem:[#allocation5 + $0x60] sm:$0xff]   ;;  %v722_v8 = vld [vmem:[#allocation5 + $0x58] sm:$0xff]  }
  0x20   :  { %620 = vmatprep.subr.bf16.mxu0 %v716_v2  ;;  %v721_v7 = vld [vmem:[#allocation5 + $0x20] sm:$0xff]   ;;  %v723_v9 = vld [vmem:[#allocation5 + $0x18] sm:$0xff]   ;;  %v724_v10 = vld [vmem:[#allocation5 + $0x50] sm:$0xff]  }
  0x21   :  { %v725_v11 = vld [vmem:[#allocation5 + $0x10] sm:$0xff]   ;;  %v735_v13 = vld [vmem:[%s945_s3 + $0x38] sm:$0xff]   ;;  %v736_v14 = vld [vmem:[%s945_s3 + $0x30] sm:$0xff]  }
  0x22   :  { %v732_v12 = vld [vmem:[#allocation2 + $0x4] ss:$8 sps:$4 sm:$0xff]   ;;  %666 = vmatprep.subr.bf16.mxu1 %v735_v13  ;;  %v728_v18 = vld [vmem:[#allocation5 + $0x40] sm:$0xff]   ;;  %v61_v21 = vld [vmem:[#allocation2 + $0x10] sm:$0xff] }
  0x23   :  { %621 = vmatpush3.bf16.msra.mxu0 %v717_v3  ;;  %246 = vmatprep.mubr.bf16.mxu0 %v732_v12  ;;  %v726_v15 = vld [vmem:[#allocation5 + $0x48] sm:$0xff]   ;;  %v737_v17 = vld [vmem:[%s945_s3 + $0x28] sm:$0xff]   ;;  %v729_v20 = vld [vmem:[#allocation5] sm:$0xff]   ;;  %v583_v23 = vcombine.high %v61_v21, %v61_v21  ;;  %v582_v24 = vcombine.low %v61_v21, %v61_v21 }
  0x24   :  { %622 = vmatprep.subr.bf16.mxu0 %v718_v4  ;;  %v727_v16 = vld [vmem:[#allocation5 + $0x8] sm:$0xff]   ;;  %667 = vmatpush3.bf16.msra.mxu1 %v735_v13  ;;  %v739_v25 = vld [vmem:[%s945_s3 + $0x18] sm:$0xff]   ;;  %v740_v26 = vld [vmem:[%s945_s3 + $0x10] sm:$0xff]  }
  0x25   :  { %668 = vmatprep.subr.bf16.mxu1 %v736_v14  ;;  %v738_v19 = vld [vmem:[%s945_s3 + $0x20] sm:$0xff]   ;;  %v741_v27 = vld [vmem:[%s945_s3 + $0x8] sm:$0xff]   ;;  %v743_v29 = vld [vmem:[%s947_s5 + $0x38] sm:$0xff]  }
  0x26   :  { %v730_v22 = vld [vmem:[#allocation2] ss:$8 sps:$4 sm:$0xff]   ;;  %v744_v30 = vld [vmem:[%s947_s5 + $0x30] sm:$0xff]   ;;  %v747_v33 = vld [vmem:[%s947_s5 + $0x18] sm:$0xff]  }
  0x27   :  { %623 = vmatpush3.bf16.msra.mxu0 %v719_v5  ;;  %v742_v28 = vld [vmem:[%s945_s3] sm:$0xff]   ;;  %v745_v31 = vld [vmem:[%s947_s5 + $0x28] sm:$0xff]   ;;  %v748_v54 = vld [vmem:[%s947_s5 + $0x10] sm:$0xff]  }
  0x28   :  { %624 = vmatprep.subr.bf16.mxu0 %v720_v6  ;;  %669 = vmatpush3.bf16.msra.mxu1 %v736_v14  ;;  %v746_v32 = vld [vmem:[%s947_s5 + $0x20] sm:$0xff]   ;;  %v749_v55 = vld [vmem:[%s947_s5 + $0x8] sm:$0xff]  }
  0x29   :  { %670 = vmatprep.subr.bf16.mxu1 %v737_v17  ;;  %v579_v38 = vld [vmem:[%s944_s2] ss:$0 sm:$0xff] }
  0x2a   :  { %v750_v56 = vld [vmem:[%s947_s5] sm:$0xff]  }
  0x2b   :  { %625 = vmatpush3.bf16.msra.mxu0 %v721_v7  ;;  %v600_v58 = vld [vmem:[%s946_s4] ss:$0 sm:$0xff] }
  0x2c   :  { %626 = vmatprep.subr.bf16.mxu0 %v722_v8  ;;  %671 = vmatpush3.bf16.msra.mxu1 %v737_v17  ;;  %v609_v7 = vld [vmem:[%s948_s6] ss:$0 sm:$0xff]  ;;  %s827_s6 = smov [#allocation7]  }
  0x2d   :  { %672 = vmatprep.subr.bf16.mxu1 %v738_v19  ;;  %s569_s29 = sshll.u32 %s827_s6, 4  ;;  %s570_s29 = int_to_ptr.vmem [resolvable:$true] %s569_s29 }
  0x2e   :  { %s795_s30 = scalar_lea.vmem %s570_s29, 128  ;;  %p800_p11 = scmp.lt.s32.totalorder %s570_s29, %s570_s29 }
  0x2f   :  { %627 = vmatpush3.bf16.msra.mxu0 %v723_v9  ;;  %p796_p10 = scmp.ne.s32.totalorder %s570_s29, %s795_s30  ;;  %p801_p12 = scmp.lt.s32.totalorder %s795_s30, %s795_s30 }
  0x30   :  { %628 = vmatprep.subr.bf16.mxu0 %v724_v10  ;;  %673 = vmatpush3.bf16.msra.mxu1 %v738_v19 }
  0x31   :  { %674 = vmatprep.subr.bf16.mxu1 %v739_v25  ;;  %p802_p13 = por %p801_p12, %p800_p11 }
  0x33   :  { %629 = vmatpush3.bf16.msra.mxu0 %v725_v11  ;;  %p803_p0 = pnand %p802_p13, %p796_p10 }
  0x34   :  { %630 = vmatprep.subr.bf16.mxu0 %v726_v15  ;;  %675 = vmatpush3.bf16.msra.mxu1 %v739_v25 }
  0x35   :  { %676 = vmatprep.subr.bf16.mxu1 %v740_v26 }
  0x37   :  { %631 = vmatpush3.bf16.msra.mxu0 %v727_v16  ;;  %v545_v16 = vld [vmem:[%s949_s7] sm:$0x3] }
  0x38   :  { %632 = vmatprep.subr.bf16.mxu0 %v728_v18  ;;  %677 = vmatpush3.bf16.msra.mxu1 %v740_v26  ;;  %v547_v17 = vrot.slane %v545_v16, 6 }
  0x39   :  { %678 = vmatprep.subr.bf16.mxu1 %v741_v27 }
  0x3b   :  { %633 = vmatpush3.bf16.msra.mxu0 %v729_v20 }
  0x3c   :  { %679 = vmatpush3.bf16.msra.mxu1 %v741_v27  ;;  %686 = vmatprep.subr.bf16.mxu0 %v743_v29 }
  0x3d   :  { %680 = vmatprep.subr.bf16.mxu1 %v742_v28 }
  0x3e   :  { %247 = vmatmul.mubr.bf16.vlgmr.msra.gmra.mxu0 %v730_v22 }
  0x3f   :  { %254 = vmatprep.mubr.bf16.mxu0 %v583_v23  ;;  %687 = vmatpush3.bf16.msra.mxu0 %v743_v29 }
  0x40   :  { %681 = vmatpush3.bf16.msra.mxu1 %v742_v28  ;;  %688 = vmatprep.subr.bf16.mxu0 %v744_v30 }
  0x43   :  { %689 = vmatpush3.bf16.msra.mxu0 %v744_v30 }
  0x44   :  { %690 = vmatprep.subr.bf16.mxu0 %v745_v31 }
  0x46   :  { %255 = vmatmul.mubr.bf16.gmra.mxu0 %v582_v24 }
  0x47   :  { %691 = vmatpush3.bf16.msra.mxu0 %v745_v31 }
  0x48   :  { %692 = vmatprep.subr.bf16.mxu0 %v746_v32 }
  0x4b   :  { %693 = vmatpush3.bf16.msra.mxu0 %v746_v32 }
  0x4c   :  { %694 = vmatprep.subr.bf16.mxu0 %v747_v33 }
  0x4f   :  { %695 = vmatpush3.bf16.msra.mxu0 %v747_v33 }
  0x50   :  { %696 = vmatprep.subr.bf16.mxu0 %v748_v54 }
  0x53   :  { %697 = vmatpush3.bf16.msra.mxu0 %v748_v54 }
  0x54   :  { %698 = vmatprep.subr.bf16.mxu0 %v749_v55 }
  0x57   :  { %699 = vmatpush3.bf16.msra.mxu0 %v749_v55 }
  0x58   :  { %700 = vmatprep.subr.bf16.mxu0 %v750_v56 }
  0x5b   :  { %701 = vmatpush3.bf16.msra.mxu0 %v750_v56 }
  0xfe   :  { %v634_v34 = vpop.f32.mrf.mxu0 }
 0x100   :  { %v635_v35 = vpop.f32.mrf.mxu0 }
 0x101   :  { %v636_v36 = vadd.f32 %v635_v35, %v634_v34 }
 0x102   :  { %v637_v37 = vpop.f32.mrf.mxu0 }
 0x103   :  { %v249_v41 = vadd.f32 %v636_v36, %v579_v38 }
 0x104   :  { %v638_v39 = vpop.f32.mrf.mxu0 }
 0x105   :  { %v639_v40 = vadd.f32 %v638_v39, %v637_v37  ;;  %v262_v46 = vmax.f32 %v249_v41, 0.0 }
 0x106   :  { %v640_v42 = vpop.f32.mrf.mxu0 }
 0x107   :  { %v252_v43 = vadd.f32 %v639_v40, %v579_v38 }
 0x108   :  { %v641_v44 = vpop.f32.mrf.mxu0 }
 0x109   :  { %v642_v45 = vadd.f32 %v641_v44, %v640_v42  ;;  %v263_v47 = vmax.f32 %v252_v43, 0.0 }
 0x10a   :  { %v643_v48 = vpop.f32.mrf.mxu0 }
 0x10b   :  { %v257_v49 = vadd.f32 %v642_v45, %v579_v38  ;;  %v265_v50 = vpack.c.bf16 %v263_v47, %v262_v46 }
 0x10c   :  { %v644_v51 = vpop.f32.mrf.mxu0 }
 0x10d   :  { %v264_v52 = vmax.f32 %v257_v49, 0.0  ;;  %682 = vmatprep.mubr.bf16.mxu1 %v265_v50 }
 0x10f   :  { %v266_v53 = vpack.c.bf16 %v264_v52, %v264_v52 }
 0x111   :  { %683 = vmatmul.mubr.bf16.vlgmr.msra.gmra.mxu1 %v266_v53 }
 0x1d1   :  { %v684_v57 = vpop.f32.mrf.mxu1 }
 0x1d2   :  { %v381_v60 = vadd.f32 %v684_v57, %v600_v58 }
 0x1d3   :  { %v372_v59 = vpop.f32.mrf.mxu1 }
 0x1d4   :  { %v373_v62 = vadd.f32 %v600_v58, %v372_v59  ;;  %v388_v1 = vmax.f32 %v381_v60, 0.0 }
 0x1d5   :  { %v685_v61 = vpop.f32.mrf.mxu1 }
 0x1d6   :  { %v386_v2 = vmax.f32 %v373_v62, 0.0  ;;  %v390_v5 = vpack.c.bf16 %v388_v1, %v388_v1 }
 0x1d7   :  { %v375_v63 = vpop.f32.mrf.mxu1 }
 0x1d8   :  { %v376_v0 = vadd.f32 %v600_v58, %v375_v63 }
 0x1da   :  { %v387_v3 = vmax.f32 %v376_v0, 0.0 }
 0x1dc   :  { %v389_v4 = vpack.c.bf16 %v387_v3, %v386_v2 }
 0x1de   :  { %702 = vmatprep.mubr.bf16.mxu0 %v389_v4 }
 0x1df   :  { %703 = vmatmul.mubr.bf16.vlgmr.msra.gmra.mxu0 %v390_v5 }
 0x29f   :  { %v704_v6 = vpop.f32.mrf.mxu0 }
 0x2a0   :  { %v505_v13 = vadd.f32 %v704_v6, %v609_v7 }
 0x2a1   :  { %v496_v8 = vpop.f32.mrf.mxu0 }
 0x2a2   :  { %v497_v9 = vadd.f32 %v609_v7, %v496_v8 }
 0x2a3   :  { %v705_v10 = vpop.f32.mrf.mxu0 }
 0x2a4   :  { %510 = vxpose.xlu0.b32.start [1/3] (short) (narrow) %v497_v9, 8 }
 0x2a5   :  { %v499_v11 = vpop.f32.mrf.mxu0 }
 0x2a6   :  { %v500_v12 = vadd.f32 %v609_v7, %v499_v11 }
 0x2a8   :  { %511 = vxpose.xlu0.b32.cont [2/3] (short) (narrow) %v500_v12, 8 }
 0x2ac   :  { %512 = vxpose.xlu0.b32.end [3/3] (short) (narrow) %v505_v13, 8 }
 0x320   :  { %v526_v14 = vpop.trf.xlu0 }
 0x321   :  { %v543_v15 = vmul.f32 1.442695, %v526_v14 }
 0x323   :  { %751 = vpow2.f32 %v543_v15 }
 0x324   :  { %753 = vtanh.f32 %v526_v14 }
 0x330   :  { %v752_v18 = vpop.eup %751 }
 0x331   :  { %v549_v19 = vmul.f32 %v752_v18, %v547_v17  ;;  %v754_v21 = vpop.eup %753 }
 0x332   :  { %v558_v24 = vsel %vm557_vm0, %v754_v21, %v752_v18 }
 0x333   :  { %v551_v20 = vrot.slane %v549_v19, 2 }
 0x335   :  { %v553_v22 = vadd.f32 %v754_v21, %v551_v20 }
 0x337   :  { %v555_v23 = vrot.slane %v553_v22, 4 }
 0x339   :  { %v560_v25 = vsel %vm559_vm1, %v558_v24, %v555_v23 }
 0x33a   :  { %562 = vst.msk [vmem:[#allocation7] sm:$0x3f] %vm561_vm2, %v560_v25 }
 0x33b   :  { %806 = shalt.err (!%p803_p0)
}
 0x33c   :  { %572 = dma.vmem_to_hbm [thread:$0]  %s570_s29, 128, %s950_s8, [#allocation4]  }
 0x33d   :  { %819 = dma.done.wait [#allocation4], 128  }
 0x33e   :  { %820 = vsyncadd [#allocation4], 4294967168 }
 0x33f   :  { %576 = vsyncpa [#allocation3], 1 }
 0x340   :  { %577 = vsyncpa [#allocation6], 1 }
 0x341   :  { %578 = vsyncpa [#allocation4], 1 }

</bundles_post_ra>
